<compile_context>
chip_gen: v5e
topology: v5e:2x2
jax: 0.10.0
libtpu: 0.0.40
codegen_flags: <defaults>
</compile_context>

<pallas_src>
import functools
import jax
import jax.numpy as jnp
from jax import lax
from jax.experimental import pallas as pl
from jax.experimental.pallas import tpu as pltpu

_NEG_BIG = 1e30  # finite "-inf": masked keys underflow to prob 0, no NaN for degenerate rows


def _flash_self_attention_kernel(kcnt_ref,                      # SMEM (nb, nk) int32 (scalar prefetch)
                                 q_ref, v_ref, mk_ref, mq_ref,  # VMEM input blocks
                                 o_ref,                         # VMEM output block
                                 m_sc, l_sc, acc_sc,            # VMEM scratch (persist over k axis)
                                 *, matmul_dtype):
    b = pl.program_id(0)
    ki = pl.program_id(2)
    nk = pl.num_programs(2)

    @pl.when(ki == 0)
    def _init():
        m_sc[...] = jnp.full_like(m_sc, -_NEG_BIG)
        l_sc[...] = jnp.zeros_like(l_sc)
        acc_sc[...] = jnp.zeros_like(acc_sc)

    # Skip key tiles in which every batch element of this block is fully masked:
    # saves the dominant exp work plus both MXU passes for that tile.
    @pl.when(kcnt_ref[b, ki] > 0)
    def _compute():
        q = q_ref[...]
        v = v_ref[...]
        if matmul_dtype is not None:          # e.g. bf16 on v5e (MXU has no f32 path there)
            q = q.astype(matmul_dtype)
            v = v.astype(matmul_dtype)
        mk = mk_ref[...].astype(jnp.float32)  # (Bb, 1, Tk), 1 = keep

        # scores[b, s, t] = sum_d q[b, s, d] * v[b, t, d]
        # contraction on D of BOTH operands -> no v.T relayout, f32 MXU accumulation.
        # No 1/sqrt(D): matches the module's forward() (it uses raw bmm).
        s = lax.dot_general(
            q, v,
            dimension_numbers=(((2,), (2,)), ((0,), (0,))),
            preferred_element_type=jnp.float32)            # (Bb, Tq, Tk)

        # masked_fill(mask == 0, -inf) as a finite additive bias (no compares/selects).
        s = s + (mk - 1.0) * _NEG_BIG

        # Online softmax update.
        m_prev = m_sc[...]
        m_new = jnp.maximum(m_prev, jnp.max(s, axis=-1, keepdims=True))
        alpha = jnp.exp(m_prev - m_new)                    # rescale factor for prior tiles
        p = jnp.exp(s - m_new)                             # (Bb, Tq, Tk)
        l_sc[...] = alpha * l_sc[...] + jnp.sum(p, axis=-1, keepdims=True)
        acc_sc[...] = alpha * acc_sc[...] + lax.dot_general(
            p.astype(v.dtype), v,
            dimension_numbers=(((2,), (1,)), ((0,), (0,))),
            preferred_element_type=jnp.float32)            # (Bb, Tq, Dp)
        m_sc[...] = m_new

    @pl.when(ki == nk - 1)
    def _finalize():
        mq = mq_ref[...].astype(jnp.float32)               # (Bb, Tq, 1) output row mask
        # Rows with >=1 valid key always end with l >= ~1 (max term is exp(0)); rows whose
        # whole mask is zero have all tiles skipped -> l == 0. Clamp so those rows produce
        # 0 (PyTorch would produce NaN there; intentional, documented divergence).
        l = jnp.maximum(l_sc[...], 0.5)
        r = pl.reciprocal(l, approx=True)                  # EUP slot, essentially free
        r = r * (2.0 - l * r)                              # one Newton step -> ~f32 accuracy
        # Fold softmax normalization and the row mask into one broadcasted scale.
        o_ref[...] = (acc_sc[...] * (mq * r)).astype(o_ref.dtype)


def _pick_seq_tile(s, target):
    """Largest 128-multiple <= target that divides s; whole s if s is small/awkward."""
    if s <= target:
        return s
    t = (target // 128) * 128
    while t >= 128:
        if s % t == 0:
            return t
        t -= 128
    return s  # fallback: no tiling along this axis


def _vmem_block_bytes(bb, tq, tk, dp, in_bytes, out_bytes):
    """Rough per-grid-step VMEM footprint for the budget check."""
    dbl = 2  # every BlockSpec-managed block is double-buffered by the pipeline
    io = dbl * (bb * tq * dp * in_bytes          # Q block
                + bb * tk * dp * in_bytes        # V block
                + bb * tk * 4 + bb * tq * 4      # key / query masks
                + bb * tq * dp * out_bytes)      # O block
    scratch = bb * tq * dp * 4 + 2 * bb * tq * 4  # acc + m + l
    live = 3 * bb * tq * tk * 4 + 2 * bb * tq * dp * 4  # scores/p/temporaries headroom
    return io + scratch + live


def self_attention_forward(query, value, mask, *,
                           q_tile=512, k_tile=512,
                           batch_block=None, matmul_dtype=None):
    """Pallas TPU SelfAttention.forward.

    query/value: (B, S, D); mask: (B, S), nonzero = keep.
    matmul_dtype: set to jnp.bfloat16 on v5e (f32 matmul is emulated there).
    """
    B, S, D = query.shape
    assert value.shape == (B, S, D) and mask.shape == (B, S)

    mask_f = mask.astype(jnp.float32)

    # Lane-dense feature dim: pad D up to a multiple of 128 (zero padding is exact for
    # both matmuls) so MXU operands and the output store are full vregs / unmasked vst.
    if D % 128 == 0:
        dp, q_in, v_in = D, query, value
    else:
        dp = ((D + 127) // 128) * 128
        q_in = jnp.pad(query, ((0, 0), (0, 0), (0, dp - D)))
        v_in = jnp.pad(value, ((0, 0), (0, 0), (0, dp - D)))

    tq = _pick_seq_tile(S, q_tile)
    tk = _pick_seq_tile(S, k_tile)
    nq, nk = S // tq, S // tk

    in_bytes = jnp.dtype(matmul_dtype if matmul_dtype is not None else query.dtype).itemsize
    out_bytes = jnp.dtype(query.dtype).itemsize

    # VMEM budget: ~75% of per-core VMEM, capped. v5e/v6e (128 MiB) -> 96 MiB;
    # v7x (64 MiB / TensorCore) -> 48 MiB.
    try:
        vmem_cap = int(getattr(pltpu.get_tpu_info(), "vmem_capacity_bytes",
                               64 * 1024 * 1024))
    except Exception:
        vmem_cap = 64 * 1024 * 1024
    vmem_budget = min(int(0.75 * vmem_cap), 96 * 1024 * 1024)

    if batch_block is None:
        # Largest divisor of B that fits the budget AND leaves >= 2 blocks of "parallel"
        # work (DMA/compute overlap everywhere, megacore sharding on v7x).
        batch_block = 1
        for cand in sorted((d for d in range(1, B + 1) if B % d == 0), reverse=True):
            if _vmem_block_bytes(cand, tq, tk, dp, in_bytes, out_bytes) > vmem_budget:
                continue
            if (B // cand) * nq >= 2 or cand == 1:
                batch_block = cand
                break
    assert B % batch_block == 0
    nb = B // batch_block

    # Per-(batch-block, key-tile) count of valid keys -> SMEM via scalar prefetch,
    # used to skip fully-masked key tiles inside the kernel.
    kcnt = mask_f.reshape(nb, batch_block, nk, tk).sum(axis=(1, 3)).astype(jnp.int32)

    mask_k = mask_f.reshape(B, 1, S)  # additive key bias, broadcast over query rows
    mask_q = mask_f.reshape(B, S, 1)  # output row mask

    kernel = functools.partial(_flash_self_attention_kernel, matmul_dtype=matmul_dtype)

    out = pl.pallas_call(
        kernel,
        out_shape=jax.ShapeDtypeStruct((B, S, dp), query.dtype),
        grid_spec=pltpu.PrefetchScalarGridSpec(
            num_scalar_prefetch=1,
            grid=(nb, nq, nk),
            in_specs=[
                pl.BlockSpec((batch_block, tq, dp), lambda b, qi, ki, kc: (b, qi, 0)),
                pl.BlockSpec((batch_block, tk, dp), lambda b, qi, ki, kc: (b, ki, 0)),
                pl.BlockSpec((batch_block, 1, tk), lambda b, qi, ki, kc: (b, 0, ki)),
                pl.BlockSpec((batch_block, tq, 1), lambda b, qi, ki, kc: (b, qi, 0)),
            ],
            out_specs=pl.BlockSpec((batch_block, tq, dp),
                                   lambda b, qi, ki, kc: (b, qi, 0)),
            scratch_shapes=[
                pltpu.VMEM((batch_block, tq, 1), jnp.float32),   # running max m
                pltpu.VMEM((batch_block, tq, 1), jnp.float32),   # running sum l
                pltpu.VMEM((batch_block, tq, dp), jnp.float32),  # output accumulator
            ]),
        compiler_params=pltpu.CompilerParams(
            dimension_semantics=("parallel", "parallel", "arbitrary"),
            vmem_limit_bytes=vmem_budget),
    )(kcnt, q_in, v_in, mask_k, mask_q)

    return out[..., :D] if dp != D else out


def reference_forward(query, value, mask):
    """Pure-JAX reference mirroring the PyTorch forward exactly (non-degenerate masks)."""
    weights = jnp.einsum('bsd,btd->bst', query, value)
    weights = jnp.where(mask[:, None, :] == 0, -jnp.inf, weights)
    attn = jax.nn.softmax(weights, axis=2)
    merged = jnp.einsum('bst,btd->bsd', attn, value)
    return merged * mask[:, :, None].astype(merged.dtype)


if __name__ == "__main__":
    # Module implies hidden = args.lstm_dim * 2; its Linear submodules (linear_q,
    # w_query, w_value, v) are only used by forward_perceptron, not by forward().
    lstm_dim = 16
    B, S, D = 2, 8, 2 * lstm_dim

    key = jax.random.PRNGKey(0)
    kq, kv = jax.random.split(key)
    query = jax.random.normal(kq, (B, S, D), dtype=jnp.float32)
    value = jax.random.normal(kv, (B, S, D), dtype=jnp.float32)

    # mask: first batch element fully valid, second valid only for first 5 positions
    mask = jnp.stack([
        jnp.ones((S,), jnp.float32),
        jnp.concatenate([jnp.ones((5,), jnp.float32), jnp.zeros((S - 5,), jnp.float32)]),
    ], axis=0)

    out = jax.block_until_ready(self_attention_forward(query, value, mask))
    ref = reference_forward(query, value, mask)

    assert out.shape == (B, S, D)
    assert not bool(jnp.any(jnp.isnan(out)))
    err = float(jnp.max(jnp.abs(out - ref)))
    assert err < 1e-3, f"mismatch vs reference: max abs err {err}"

    print("KERNEL_OK")
</pallas_src>

<mosaic_0001>
module attributes {stable_mosaic.version = 11 : i64} {
  func.func @_flash_self_attention_kernel(%arg0: i32, %arg1: i32, %arg2: i32, %arg3: memref<2x1xi32, #tpu.memory_space<smem>>, %arg4: memref<1x8x128xf32, #tpu.memory_space<vmem>>, %arg5: memref<1x8x128xf32, #tpu.memory_space<vmem>>, %arg6: memref<1x1x8xf32, #tpu.memory_space<vmem>>, %arg7: memref<1x8x1xf32, #tpu.memory_space<vmem>>, %arg8: memref<1x8x128xf32, #tpu.memory_space<vmem>>, %arg9: memref<1x8x1xf32, #tpu.memory_space<vmem>>, %arg10: memref<1x8x1xf32, #tpu.memory_space<vmem>>, %arg11: memref<1x8x128xf32, #tpu.memory_space<vmem>>) attributes {dimension_semantics = [#tpu.dimension_semantics<parallel>, #tpu.dimension_semantics<parallel>, #tpu.dimension_semantics<arbitrary>], iteration_bounds = array<i64: 2, 1, 1>, scalar_prefetch = 1 : i64, scratch_operands = 3 : i64, tpu.core_type = #tpu.core_type<tc>, window_params = [{transform_indices = @transform_0, window_bounds = array<i64: 1, 8, 128>}, {transform_indices = @transform_1, window_bounds = array<i64: 1, 8, 128>}, {transform_indices = @transform_2, window_bounds = array<i64: 1, 1, 8>}, {transform_indices = @transform_3, window_bounds = array<i64: 1, 8, 1>}, {transform_indices = @transform_4, window_bounds = array<i64: 1, 8, 128>}]} {
    %c0_i32 = arith.constant 0 : i32
    %0 = arith.cmpi eq, %arg2, %c0_i32 : i32
    %1 = arith.extui %0 : i1 to i32
    %c0_i32_0 = arith.constant 0 : i32
    %2 = arith.cmpi ne, %1, %c0_i32_0 : i32
    scf.if %2 {
      %cst = arith.constant -1.000000e+30 : f32
      %12 = vector.broadcast %cst : f32 to vector<1x8x1xf32>
      %c0 = arith.constant 0 : index
      %c0_5 = arith.constant 0 : index
      %c0_6 = arith.constant 0 : index
      %13 = vector.load %arg9[%c0, %c0_5, %c0_6] : memref<1x8x1xf32, #tpu.memory_space<vmem>>, vector<1x8x1xf32>
      tpu.vector_store %arg9[%c0, %c0_5, %c0_6], %12 {strides = array<i32>} : memref<1x8x1xf32, #tpu.memory_space<vmem>>, vector<1x8x1xf32>,
      %cst_7 = arith.constant 0.000000e+00 : f32
      %14 = vector.broadcast %cst_7 : f32 to vector<1x8x1xf32>
      %c0_8 = arith.constant 0 : index
      %c0_9 = arith.constant 0 : index
      %c0_10 = arith.constant 0 : index
      %15 = vector.load %arg10[%c0_8, %c0_9, %c0_10] : memref<1x8x1xf32, #tpu.memory_space<vmem>>, vector<1x8x1xf32>
      tpu.vector_store %arg10[%c0_8, %c0_9, %c0_10], %14 {strides = array<i32>} : memref<1x8x1xf32, #tpu.memory_space<vmem>>, vector<1x8x1xf32>,
      %cst_11 = arith.constant 0.000000e+00 : f32
      %16 = vector.broadcast %cst_11 : f32 to vector<1x8x128xf32>
      %c0_12 = arith.constant 0 : index
      %c0_13 = arith.constant 0 : index
      %c0_14 = arith.constant 0 : index
      %17 = vector.load %arg11[%c0_12, %c0_13, %c0_14] : memref<1x8x128xf32, #tpu.memory_space<vmem>>, vector<1x8x128xf32>
      tpu.vector_store %arg11[%c0_12, %c0_13, %c0_14], %16 {strides = array<i32>} : memref<1x8x128xf32, #tpu.memory_space<vmem>>, vector<1x8x128xf32>,
    } else {
    }
    %3 = arith.index_cast %arg0 : i32 to index
    %4 = arith.index_cast %arg2 : i32 to index
    %5 = memref.load %arg3[%3, %4] : memref<2x1xi32, #tpu.memory_space<smem>>
    %c0_i32_1 = arith.constant 0 : i32
    %6 = arith.cmpi sgt, %5, %c0_i32_1 : i32
    %7 = arith.extui %6 : i1 to i32
    %c0_i32_2 = arith.constant 0 : i32
    %8 = arith.cmpi ne, %7, %c0_i32_2 : i32
    scf.if %8 {
      %c0 = arith.constant 0 : index
      %c0_5 = arith.constant 0 : index
      %c0_6 = arith.constant 0 : index
      %12 = vector.load %arg4[%c0, %c0_5, %c0_6] : memref<1x8x128xf32, #tpu.memory_space<vmem>>, vector<1x8x128xf32>
      %c0_7 = arith.constant 0 : index
      %c0_8 = arith.constant 0 : index
      %c0_9 = arith.constant 0 : index
      %13 = vector.load %arg5[%c0_7, %c0_8, %c0_9] : memref<1x8x128xf32, #tpu.memory_space<vmem>>, vector<1x8x128xf32>
      %c0_10 = arith.constant 0 : index
      %c0_11 = arith.constant 0 : index
      %c0_12 = arith.constant 0 : index
      %14 = vector.load %arg6[%c0_10, %c0_11, %c0_12] : memref<1x1x8xf32, #tpu.memory_space<vmem>>, vector<1x1x8xf32>
      %cst = arith.constant dense<0.000000e+00> : vector<1x8x8xf32>
      %15 = tpu.matmul %12, %13, %cst {dimension_numbers = #tpu.dot_dimension_numbers<[2], [2], [1], [1], [0, 0, 0, 1, 1, 1], [0], [0]>} : vector<1x8x128xf32>, vector<1x8x128xf32>, vector<1x8x8xf32> -> vector<1x8x8xf32>
      %cst_13 = arith.constant 1.000000e+00 : f32
      %16 = vector.broadcast %cst_13 : f32 to vector<1x1x8xf32>
      %17 = arith.subf %14, %16 : vector<1x1x8xf32>
      %cst_14 = arith.constant 1.000000e+30 : f32
      %18 = vector.broadcast %cst_14 : f32 to vector<1x1x8xf32>
      %19 = arith.mulf %17, %18 : vector<1x1x8xf32>
      %20 = vector.broadcast %19 : vector<1x1x8xf32> to vector<1x8x8xf32>
      %21 = arith.addf %15, %20 : vector<1x8x8xf32>
      %c0_15 = arith.constant 0 : index
      %c0_16 = arith.constant 0 : index
      %c0_17 = arith.constant 0 : index
      %22 = vector.load %arg9[%c0_15, %c0_16, %c0_17] : memref<1x8x1xf32, #tpu.memory_space<vmem>>, vector<1x8x1xf32>
      %cst_18 = arith.constant dense<0xFF800000> : vector<1x8xf32>
      %23 = vector.multi_reduction <maximumf>, %21, %cst_18 [2] : vector<1x8x8xf32> to vector<1x8xf32>
      %24 = vector.shape_cast %23 : vector<1x8xf32> to vector<1x8x1xf32>
      %25 = arith.maximumf %22, %24 : vector<1x8x1xf32>
      %26 = arith.subf %22, %25 : vector<1x8x1xf32>
      %27 = math.exp %26 : vector<1x8x1xf32>
      %28 = vector.broadcast %25 : vector<1x8x1xf32> to vector<1x8x8xf32>
      %29 = arith.subf %21, %28 : vector<1x8x8xf32>
      %30 = math.exp %29 : vector<1x8x8xf32>
      %c0_19 = arith.constant 0 : index
      %c0_20 = arith.constant 0 : index
      %c0_21 = arith.constant 0 : index
      %31 = vector.load %arg10[%c0_19, %c0_20, %c0_21] : memref<1x8x1xf32, #tpu.memory_space<vmem>>, vector<1x8x1xf32>
      %32 = arith.mulf %27, %31 : vector<1x8x1xf32>
      %cst_22 = arith.constant dense<0.000000e+00> : vector<1x8xf32>
      %33 = vector.multi_reduction <add>, %30, %cst_22 [2] : vector<1x8x8xf32> to vector<1x8xf32>
      %34 = vector.shape_cast %33 : vector<1x8xf32> to vector<1x8x1xf32>
      %35 = arith.addf %32, %34 : vector<1x8x1xf32>
      %c0_23 = arith.constant 0 : index
      %c0_24 = arith.constant 0 : index
      %c0_25 = arith.constant 0 : index
      %36 = vector.load %arg10[%c0_23, %c0_24, %c0_25] : memref<1x8x1xf32, #tpu.memory_space<vmem>>, vector<1x8x1xf32>
      tpu.vector_store %arg10[%c0_23, %c0_24, %c0_25], %35 {strides = array<i32>} : memref<1x8x1xf32, #tpu.memory_space<vmem>>, vector<1x8x1xf32>,
      %c0_26 = arith.constant 0 : index
      %c0_27 = arith.constant 0 : index
      %c0_28 = arith.constant 0 : index
      %37 = vector.load %arg11[%c0_26, %c0_27, %c0_28] : memref<1x8x128xf32, #tpu.memory_space<vmem>>, vector<1x8x128xf32>
      %38 = vector.broadcast %27 : vector<1x8x1xf32> to vector<1x8x128xf32>
      %39 = arith.mulf %38, %37 : vector<1x8x128xf32>
      %cst_29 = arith.constant dense<0.000000e+00> : vector<1x8x128xf32>
      %40 = tpu.matmul %30, %13, %cst_29 {dimension_numbers = #tpu.dot_dimension_numbers<[2], [1], [1], [2], [0, 0, 0, 1, 1, 2], [0], [0]>} : vector<1x8x8xf32>, vector<1x8x128xf32>, vector<1x8x128xf32> -> vector<1x8x128xf32>
      %41 = arith.addf %39, %40 : vector<1x8x128xf32>
      %c0_30 = arith.constant 0 : index
      %c0_31 = arith.constant 0 : index
      %c0_32 = arith.constant 0 : index
      %42 = vector.load %arg11[%c0_30, %c0_31, %c0_32] : memref<1x8x128xf32, #tpu.memory_space<vmem>>, vector<1x8x128xf32>
      tpu.vector_store %arg11[%c0_30, %c0_31, %c0_32], %41 {strides = array<i32>} : memref<1x8x128xf32, #tpu.memory_space<vmem>>, vector<1x8x128xf32>,
      %c0_33 = arith.constant 0 : index
      %c0_34 = arith.constant 0 : index
      %c0_35 = arith.constant 0 : index
      %43 = vector.load %arg9[%c0_33, %c0_34, %c0_35] : memref<1x8x1xf32, #tpu.memory_space<vmem>>, vector<1x8x1xf32>
      tpu.vector_store %arg9[%c0_33, %c0_34, %c0_35], %25 {strides = array<i32>} : memref<1x8x1xf32, #tpu.memory_space<vmem>>, vector<1x8x1xf32>,
    } else {
    }
    %c0_i32_3 = arith.constant 0 : i32
    %9 = arith.cmpi eq, %arg2, %c0_i32_3 : i32
    %10 = arith.extui %9 : i1 to i32
    %c0_i32_4 = arith.constant 0 : i32
    %11 = arith.cmpi ne, %10, %c0_i32_4 : i32
    scf.if %11 {
      %c0 = arith.constant 0 : index
      %c0_5 = arith.constant 0 : index
      %c0_6 = arith.constant 0 : index
      %12 = vector.load %arg7[%c0, %c0_5, %c0_6] : memref<1x8x1xf32, #tpu.memory_space<vmem>>, vector<1x8x1xf32>
      %c0_7 = arith.constant 0 : index
      %c0_8 = arith.constant 0 : index
      %c0_9 = arith.constant 0 : index
      %13 = vector.load %arg10[%c0_7, %c0_8, %c0_9] : memref<1x8x1xf32, #tpu.memory_space<vmem>>, vector<1x8x1xf32>
      %cst = arith.constant 5.000000e-01 : f32
      %14 = vector.broadcast %cst : f32 to vector<1x8x1xf32>
      %15 = arith.maximumf %13, %14 : vector<1x8x1xf32>
      %16 = tpu.reciprocal %15 {approx = true} : vector<1x8x1xf32> -> vector<1x8x1xf32>
      %17 = arith.mulf %15, %16 : vector<1x8x1xf32>
      %cst_10 = arith.constant 2.000000e+00 : f32
      %18 = vector.broadcast %cst_10 : f32 to vector<1x8x1xf32>
      %19 = arith.subf %18, %17 : vector<1x8x1xf32>
      %20 = arith.mulf %16, %19 : vector<1x8x1xf32>
      %c0_11 = arith.constant 0 : index
      %c0_12 = arith.constant 0 : index
      %c0_13 = arith.constant 0 : index
      %21 = vector.load %arg11[%c0_11, %c0_12, %c0_13] : memref<1x8x128xf32, #tpu.memory_space<vmem>>, vector<1x8x128xf32>
      %22 = arith.mulf %12, %20 : vector<1x8x1xf32>
      %23 = vector.broadcast %22 : vector<1x8x1xf32> to vector<1x8x128xf32>
      %24 = arith.mulf %21, %23 : vector<1x8x128xf32>
      %c0_14 = arith.constant 0 : index
      %c0_15 = arith.constant 0 : index
      %c0_16 = arith.constant 0 : index
      %25 = vector.load %arg8[%c0_14, %c0_15, %c0_16] : memref<1x8x128xf32, #tpu.memory_space<vmem>>, vector<1x8x128xf32>
      tpu.vector_store %arg8[%c0_14, %c0_15, %c0_16], %24 {strides = array<i32>} : memref<1x8x128xf32, #tpu.memory_space<vmem>>, vector<1x8x128xf32>,
    } else {
    }
    return
  }
  func.func @transform_0(%arg0: i32, %arg1: i32, %arg2: i32, %arg3: memref<2x1xi32, #tpu.memory_space<smem>>) -> (i32, i32, i32) {
    %c0_i32 = arith.constant 0 : i32
    %c0_i32_0 = arith.constant 0 : i32
    return %arg0, %arg1, %c0_i32 : i32, i32, i32
  }
  func.func @transform_1(%arg0: i32, %arg1: i32, %arg2: i32, %arg3: memref<2x1xi32, #tpu.memory_space<smem>>) -> (i32, i32, i32) {
    %c0_i32 = arith.constant 0 : i32
    %c0_i32_0 = arith.constant 0 : i32
    return %arg0, %arg2, %c0_i32 : i32, i32, i32
  }
  func.func @transform_2(%arg0: i32, %arg1: i32, %arg2: i32, %arg3: memref<2x1xi32, #tpu.memory_space<smem>>) -> (i32, i32, i32) {
    %c0_i32 = arith.constant 0 : i32
    %c0_i32_0 = arith.constant 0 : i32
    return %arg0, %c0_i32, %arg2 : i32, i32, i32
  }
  func.func @transform_3(%arg0: i32, %arg1: i32, %arg2: i32, %arg3: memref<2x1xi32, #tpu.memory_space<smem>>) -> (i32, i32, i32) {
    %c0_i32 = arith.constant 0 : i32
    %c0_i32_0 = arith.constant 0 : i32
    return %arg0, %arg1, %c0_i32 : i32, i32, i32
  }
  func.func @transform_4(%arg0: i32, %arg1: i32, %arg2: i32, %arg3: memref<2x1xi32, #tpu.memory_space<smem>>) -> (i32, i32, i32) {
    %c0_i32 = arith.constant 0 : i32
    %c0_i32_0 = arith.constant 0 : i32
    return %arg0, %arg1, %c0_i32 : i32, i32, i32
  }
}

</mosaic_0001>

<bundles_post_ra>
// kernel: tpu_custom_call.1
= control target key start
LH: loop header
LB: loop body
LE: loop exit
PB: predicated region body
PF: predicated region fallthrough
CT: control target
= control target key end

     0   :  { %s819_s21 = smov [#allocation6]   ;;  %s1003_s0 = inlined_call_operand.vmem [shape: s32[2,1], index: 0, kind: input, shape index: {}]   ;;  %s1004_s1 = inlined_call_operand.vmem [shape: f32[2,8,128], index: 1, kind: input, shape index: {}]   ;;  %s1005_s2 = inlined_call_operand.hbm [shape: f32[2,8,128], index: 2, kind: input, shape index: {}]   ;;  %s1006_s3 = inlined_call_operand.vmem [shape: f32[2,1,8], index: 3, kind: input, shape index: {}]   ;;  %s1007_s4 = inlined_call_operand.vmem [shape: f32[2,8,1], index: 4, kind: input, shape index: {}]   ;;  %s1008_s5 = inlined_call_operand.hbm [shape: f32[2,8,128], index: 5, kind: output, shape index: {}]  }
   0x1   :  { %s11_s20 = sshll.u32 %s1003_s0, 4  ;;  %s12_s20 = int_to_ptr.vmem [resolvable:$true] %s11_s20 }
   0x2   :  { %14 = dma.vmem_to_smem %s12_s20, 32, %s819_s21, [#allocation5] }
   0x3   :  { %785 = dma.done.wait [#allocation5], 32 }
   0x4   :  { %786 = vsyncadd [#allocation5], 4294967264 }
   0x5   :  { %17 = sfence }
   0x6   :  { %18 = vsyncpa [#allocation8], 0 }
   0x7   :  { %20 = vsyncpa [#allocation8 + $0x1], 0 }
   0x8   :  { %21 = vsyncpa [#allocation9], 0 }
   0x9   :  { %23 = vsyncpa [#allocation9 + $0x1], 0  ;;  %s857_s22 = smov 0   ;;  %s859_s23 = smov 0  }
   0xa   :  { %s861_s24 = smov 0   ;;  %s863_s25 = smov 0  }
   0xb   :  { %s865_s26 = smov 0   ;;  %s867_s0 = smov 0  }
   0xc LB: > { %s596_s27 = sadd.s32 4294967295, %s817_s0   ;;  %s597_s28 = sadd.s32 4294967294, %s817_s0   ;;  %s817_s0 = sphi %s867_s0, %s29_s0   ;;  %s813_s26 = sphi %s865_s26, %s1017_s26   ;;  %s809_s25 = sphi %s863_s25, %s1016_s25   ;;  %s805_s24 = sphi %s861_s24, %s1015_s24   ;;  %s801_s23 = sphi %s859_s23, %s1014_s23   ;;  %s797_s22 = sphi %s857_s22, %s1013_s22  }
   0xd   : > { %s48_s29 = sadd.s32 1, %s813_s26  ;;  %s85_s30 = sadd.s32 1, %s805_s24 }
   0xe   : > { %p50_p0 = scmp.ge.s32.totalorder %s48_s29, 2  ;;  %p92_p1 = scmp.ne.s32.totalorder %s805_s24, %s801_s23 }
   0xf   : > { %p93_p2 = scmp.eq.s32.totalorder %s817_s0, 0  ;;  %p98_p3 = scmp.ne.s32.totalorder %s801_s23, %s797_s22 }
  0x10   : > { %s1019_s29 = smov (%p50_p0, %s48_s29), 0  ;;  %p99_p5 = scmp.eq.s32.totalorder %s596_s27, 0 }
  0x11   : > { %p898_p4 = por %p93_p2, %p92_p1  ;;  %s80_s7 = ssub.s32 %s813_s26, %s1019_s29 }
  0x12   : > { %p180_p6 = scmp.eq.s32.totalorder %s596_s27, 1  ;;  %p83_p7 = scmp.eq.s32.totalorder %s80_s7, 0 }
  0x13   : > { %p904_p8 = por %p99_p5, %p98_p3  ;;  %p186_p10 = scmp.eq.s32.totalorder %s597_s28, 1 }
  0x14   : > { %p908_p9 = por %p180_p6, %p92_p1  ;;  %p599_p12 = scmp.ge.s32.totalorder %s817_s0, 2 }
  0x15   : > { %s913_s10 = scalar_select %p83_p7, %s805_s24, %s85_s30  }
  0x16   : > { %p915_p11 = por %p186_p10, %p98_p3  ;;  %p627_p13 = scmp.lt.s32.totalorder %s817_s0, 2 }
  0x17   : > { %s216_s12 = sand.u32 1, %s805_s24   ;;  %s601_s14 = sshll.u32 %s813_s26, 3 }
  0x18   : > { %s600_s13 = sshll.u32 %s216_s12, 3  ;;  %s225_s17 = scalar_lea.hbm %s1005_s2, %s601_s14 }
  0x19   : > { %s220_s18 = scalar_lea.vmem [#allocation7], %s600_s13  ;;  %s227_s20 = sshll.u32 %s225_s17, 4  ;;  %s228_s20 = int_to_ptr.hbm [resolvable:$true] %s227_s20 }
  0x1a   : > { %s229_s19 = sshll.u32 %s220_s18, 4  ;;  %p620_p0 = pnand %p627_p13, %p898_p4  ;;  %s230_s19 = int_to_ptr.vmem [resolvable:$true] %s229_s19 }
  0x1b   : > { %p602_p1 = scmp.ge.s32.totalorder %s817_s0, 1  ;;  %p253_p2 = scmp.lt.s32.totalorder %s817_s0, 3 }
  0x1c   : > { %s217_s21 = scalar_lea.sflag [#allocation8], %s216_s12 }
  0x1d   : > { %622 = dma.hbm_to_vmem [thread:$0]  (!%p620_p0), %s228_s20, 128, %s230_s19, %s217_s21  }
  0x1e   : > { %p254_p3 = pnand %p602_p1, %p253_p2 }
  0x1f   : > { %s931_s27 = sand.u32 (!%p254_p3), 1, %s801_s23  }
  0x20   : > { %257 = sbr.rel (%p254_p3) target bundleno = 696 (0x2b8), region = 36  ;;  %s603_s28 = sshll.u32 (!%p254_p3), %s931_s27, 3 }
  0x21   : > { %s260_s30 = scalar_lea.sflag (!%p254_p3), [#allocation8], %s931_s27  ;;  %s263_s7 = scalar_lea.vmem (!%p254_p3), [#allocation7], %s603_s28 }
  0x25   : > { %788 = dma.done.wait (%p904_p8), %s260_s30, 128  }
  0x26   : > { %790 = vsyncadd (%p904_p8), %s260_s30, 4294967168  ;;  %s607_s6 = sshll.u32 %s809_s25, 7  ;;  %vm333_vm0 = vcmask 7168   ;;  %p309_p4 = scmp.lt.s32.totalorder %s809_s25, 1  ;;  %v820_v0 = vmov -1e+30  }
  0x27   : > { %s344_s12 = sld [smem:[#allocation6 + %s607_s6]]  ;;  %334 = vst.msk [vmem:[#allocation2] sm:$0xff] %vm333_vm0, %v820_v0  ;;  %v821_v1 = vmov 0.0   ;;  %s955_s6 = scalar_lea.vmem [#allocation10], %s603_s28 }
  0x28   : > { %335 = vst.msk [vmem:[#allocation3] sm:$0xff] %vm333_vm0, %v821_v1  ;;  %s310_s13 = scalar_select %p309_p4, %s809_s25, 1 }
  0x29   : > { %336 = vst [vmem:[#allocation4] sm:$0xff] %v821_v1 }
  0x2a   : > { %s605_s14 = sshll.u32 %s310_s13, 3  ;;  %s321_s8 = scalar_lea.vmem %s1006_s3, %s310_s13 }
  0x2b   : > { %s315_s19 = scalar_lea.vmem %s1004_s1, %s605_s14  ;;  %s953_s30 = scalar_lea.vmem %s1007_s4, %s605_s14 }
  0x2d   : > { %p608_p5 = scmp.le.s32.totalorder %s344_s12, 0 }
  0x2f   : > { %348 = sbr.rel (%p608_p5) target bundleno = 558 (0x22e), region = 48 }
  0x34   : > { %v350_v2 = vld [vmem:[%s263_s7] sm:$0xff]  ;;  %vm378_vm1 = vcmask 64512   ;;  %v822_v11 = vmov 0   ;;  %v394_v24 = vld [vmem:[#allocation3] sm:$0xff]  ;;  %v402_v28 = vld [vmem:[#allocation4] sm:$0xff] }
  0x35   : > { %372 = vmatpush.xpose.msra.mxu0 %v350_v2  ;;  %v349_v3 = vld [vmem:[%s315_s19] sm:$0xff]  ;;  %427 = vmatpush.msra.mxu1 %v350_v2 }
  0x36   : > { %v351_v4 = vld [vmem:[%s321_s8] sm:$0x1]  ;;  %682 = vset.pattern.permute.xlu0 %v822_v11  ;;  %683 = vset.pattern.permute.xlu1 %v822_v11 }
  0x37   : > { %v609_v5 = vadd.f32 -1.0, %v351_v4  ;;  %v377_v12 = vld [vmem:[#allocation2] sm:$0xff] }
  0x38   : > { %373 = vmatmul.f32.vlgmr.msra.gmra.mxu0 %v349_v3 }
  0x39   : > { %v353_v6 = vmul.f32 1e+30, %v609_v5 }
  0x3b   : > { %v355_v7 = vperm.slane %v353_v6, 0 }
  0xb5   : > { %v374_v8 = vpop.f32.mrf.mxu0 }
  0xb6   : > { %v375_v9 = vadd.f32 %v374_v8, %v355_v7 }
  0xb8   : > { %v379_v10 = vsel %vm378_vm1, %v375_v9, -inf }
  0xb9   : > { %380 = vmax.xlane.f32.xlu0 %v379_v10 }
 0x12c   : > { %v381_v13 = vpop.xlane.xlu0 %380 }
 0x12d   : > { %v382_v14 = vmax.f32 %v377_v12, %v381_v13 }
 0x12f   : > { %v383_v15 = vsub.f32 %v377_v12, %v382_v14  ;;  %434 = vst.msk [vmem:[#allocation2] sm:$0xff] %vm333_vm0, %v382_v14  ;;  %388 = vperm.xlu0 %682, %v382_v14  }
 0x131   : > { %v384_v16 = vmul.f32 1.442695, %v383_v15 }
 0x133   : > { %684 = vpow2.f32 %v384_v16 }
 0x139   : > { %v685_v17 = vpop.eup %684 }
 0x13a   : > { %405 = vperm.xlu1 %683, %v685_v17   ;;  %v395_v25 = vmul.f32 %v685_v17, %v394_v24 }
 0x1a1   : > { %v389_v18 = vpop.permute.xlu0 %388 }
 0x1a2   : > { %v391_v19 = vsub.f32 %v375_v9, %v389_v18 }
 0x1a4   : > { %v392_v20 = vmul.f32 1.442695, %v391_v19 }
 0x1a6   : > { %686 = vpow2.f32 %v392_v20 }
 0x1ac   : > { %v687_v21 = vpop.eup %686  ;;  %v406_v23 = vpop.permute.xlu1 %405 }
 0x1ad   : > { %610 = vmatmul.msk.f32.vlgmr.msra.gmra.mxu1 %vm378_vm1, %v687_v21  ;;  %v396_v22 = vsel %vm378_vm1, %v687_v21, 0.0  ;;  %v408_v29 = vmul.f32 %v406_v23, %v402_v28 }
 0x1ae   : > { %397 = vadd.xlane.f32.xlu1 %v396_v22 }
 0x221   : > { %v398_v26 = vpop.xlane.xlu1 %397 }
 0x222   : > { %v399_v27 = vadd.f32 %v398_v26, %v395_v25 }
 0x224   : > { %401 = vst.msk [vmem:[#allocation3] sm:$0xff] %vm333_vm0, %v399_v27 }
 0x22a   : > { %v429_v30 = vpop.f32.mrf.mxu1 }
 0x22b   : > { %v432_v31 = vadd.f32 %v429_v30, %v408_v29 }
 0x22d   : > { %433 = vst [vmem:[#allocation4] sm:$0xff] %v432_v31 }
 0x22e PF: > { %v439_v32 = vld [vmem:[#allocation3] sm:$0xff]  ;;  %v823_v33 = vmov 0   ;;  %v438_v38 = vld [vmem:[%s953_s30] sm:$0xff]  ;;  %s612_s28 = sshll.u32 %s809_s25, 3  ;;  %s468_s14 = sshll.u32 %s955_s6, 4  ;;  %s469_s14 = int_to_ptr.vmem [resolvable:$true] %s468_s14 }
 0x22f   : > { %688 = vset.pattern.permute.xlu0 %v823_v33  ;;  %v440_v34 = vmax.f32 %v439_v32, 0.5  ;;  %s466_s13 = scalar_lea.hbm %s1008_s5, %s612_s28  ;;  %s455_s16 = scalar_lea.sflag [#allocation9], %s931_s27 }
 0x230   : > { %s470_s15 = sshll.u32 %s466_s13, 4  ;;  %s753_s19 = scalar_lea.hbm %s1008_s5, 16  ;;  %s471_s15 = int_to_ptr.hbm [resolvable:$true] %s470_s15 }
 0x231   : > { %689 = vrcp.f32 %v440_v34  ;;  %s747_s8 = sshra.s32 %s471_s15, 4  ;;  %s748_s8 = int_to_ptr.hbm [resolvable:$true] %s747_s8 }
 0x232   : > { %s749_s17 = scalar_lea.hbm %s748_s8, 8  ;;  %p754_p10 = scmp.lt.s32.totalorder %s748_s8, %s1008_s5 }
 0x233   : > { %p750_p6 = scmp.ne.s32.totalorder %s748_s8, %s749_s17  ;;  %p755_p13 = scmp.lt.s32.totalorder %s753_s19, %s749_s17 }
 0x234   : > { %v445_v41 = vld [vmem:[#allocation4] sm:$0xff] }
 0x235   : > { %p751_p7 = pnand %p750_p6, %p908_p9  ;;  %p756_p0 = por %p755_p13, %p754_p10 }
 0x237   : > { %v690_v35 = vpop.eup %689  ;;  %p752_p8 = pneg %p751_p7 }
 0x238   : > { %v442_v36 = vmul.f32 %v690_v35, %v440_v34 }
 0x239   : > { %p757_p1 = pnand %p756_p0, %p752_p8 }
 0x23a   : > { %v443_v37 = vsub.f32 2.0, %v442_v36 }
 0x23c   : > { %v444_v39 = vmul.f32 %v690_v35, %v443_v37 }
 0x23e   : > { %v446_v40 = vmul.f32 %v444_v39, %v438_v38 }
 0x240   : > { %449 = vperm.xlu0 %688, %v446_v40  }
 0x2b2   : > { %v450_v42 = vpop.permute.xlu0 %449 }
 0x2b3   : > { %v452_v43 = vmul.f32 %v450_v42, %v445_v41 }
 0x2b5   : > { %453 = vst [vmem:[%s955_s6] sm:$0xff] %v452_v43 }
 0x2b6   : > { %760 = shalt.err (!%p757_p1)
}
 0x2b7   : > { %617 = dma.vmem_to_hbm [thread:$0]  (%p908_p9), %s469_s14, 128, %s471_s15, %s455_s16  }
 0x2b8 PF: > { %s482_s27 = sand.u32 1, %s797_s22   ;;  %p624_p2 = pnand %p599_p12, %p915_p11 }
 0x2b9   : > { %s483_s30 = scalar_lea.sflag [#allocation9], %s482_s27 }
 0x2ba   : > { %p625_p3 = pneg %p624_p2 }
 0x2bc   : > { %792 = dma.done.wait (%p625_p3), %s483_s30, 128  }
 0x2bd   : > { %794 = vsyncadd (%p625_p3), %s483_s30, 4294967168  ;;  %s29_s0 = sadd.s32 1, %s817_s0   ;;  %s1013_s22 = smov %s801_s23 }
 0x2be   : > { %p26_p4 = scmp.ge.s32.totalorder %s29_s0, 4   ;;  %s1014_s23 = smov %s805_s24 }
 0x2bf   : > { %s1015_s24 = smov %s913_s10  ;;  %s1016_s25 = smov %s813_s26 }
 0x2c0   : > { %s1017_s26 = smov %s1019_s29  ;;  %28 = sbr.rel (!%p26_p4) target bundleno = 12 (0xc), region = 102 }
 0x2c5   :  { %489 = vsyncpa [#allocation8], 1 }
 0x2c6   :  { %491 = vsyncpa [#allocation8 + $0x1], 1 }
 0x2c7   :  { %492 = vsyncpa [#allocation9], 1 }
 0x2c8   :  { %494 = vsyncpa [#allocation9 + $0x1], 1 }

</bundles_post_ra>
